<compile_context>
chip_gen: v5e
topology: v5e:2x2
jax: 0.10.0
libtpu: 0.0.40
codegen_flags: <defaults>
</compile_context>

<pallas_src>
import functools

import jax
import jax.numpy as jnp
from jax.experimental import pallas as pl
from jax.experimental.pallas import tpu as pltpu


def _round_up(x, m):
    return ((x + m - 1) // m) * m


def _policy_mean_kernel(state_ref, w1_ref, b1_ref, w2_ref, b2_ref,
                        wm_ref, bm_ref, mean_ref, *, action_range):
    """mean = action_range * tanh(relu(relu(x@W1+b1)@W2+b2)@Wm+bm), f32."""
    x = state_ref[...]                                                # [TB, I]
    h1 = jnp.maximum(
        jnp.dot(x, w1_ref[...], preferred_element_type=jnp.float32) + b1_ref[...],
        0.0)                                                          # [TB, H]
    h2 = jnp.maximum(
        jnp.dot(h1, w2_ref[...], preferred_element_type=jnp.float32) + b2_ref[...],
        0.0)                                                          # [TB, H]
    pre = jnp.dot(h2, wm_ref[...], preferred_element_type=jnp.float32) + bm_ref[...]
    mean_ref[...] = action_range * jnp.tanh(pre)                      # [TB, AP]


def prepare_policy_params(params, lane=128):
    """One-time conversion of PyTorch-convention params into kernel layout.

    Weights become (in, out); the mean head is zero-padded to a lane-dense
    (H, 128) slab so the kernel's output store is unmasked. Call once per
    parameter update, NOT per forward step.
    """
    A = params["mean_w"].shape[0]
    H = params["w1"].shape[0]
    ap = _round_up(max(A, lane), lane)
    wm = jnp.zeros((H, ap), jnp.float32).at[:, :A].set(params["mean_w"].T)
    bm = jnp.zeros((1, ap), jnp.float32).at[:, :A].set(params["mean_b"][None, :])
    return {
        "w1": params["w1"].T.astype(jnp.float32),               # (I, H)
        "b1": params["b1"].reshape(1, -1).astype(jnp.float32),  # (1, H)
        "w2": params["w2"].T.astype(jnp.float32),               # (H, H)
        "b2": params["b2"].reshape(1, -1).astype(jnp.float32),  # (1, H)
        "wm": wm,                                               # (H, AP) lane-dense
        "bm": bm,                                               # (1, AP)
        "log_std": params["log_std_bias"].reshape(1, -1).astype(jnp.float32),  # (1, A)
    }


def policy_network_forward(state, prepared, action_range=1.0, block_b=256):
    """state: [B, num_inputs] f32. prepared: output of prepare_policy_params."""
    B, I = state.shape
    H = prepared["w1"].shape[1]
    AP = prepared["wm"].shape[1]          # lane-padded action dim (128)
    A = prepared["log_std"].shape[1]      # true action dim

    # Pad batch to a multiple of 8 sublanes and of the batch tile.
    if B <= block_b:
        TB = _round_up(B, 8)
        B_pad = TB
    else:
        TB = block_b
        B_pad = _round_up(B, TB)
    if B_pad != B:
        state = jnp.pad(state, ((0, B_pad - B), (0, 0)))

    kernel = functools.partial(_policy_mean_kernel,
                               action_range=float(action_range))

    mean_full = pl.pallas_call(
        kernel,
        out_shape=jax.ShapeDtypeStruct((B_pad, AP), jnp.float32),
        grid=(B_pad // TB,),
        in_specs=[
            pl.BlockSpec((TB, I), lambda i: (i, 0)),   # state: tiled over batch
            pl.BlockSpec((I, H), lambda i: (0, 0)),    # W1 (replicated)
            pl.BlockSpec((1, H), lambda i: (0, 0)),    # b1
            pl.BlockSpec((H, H), lambda i: (0, 0)),    # W2
            pl.BlockSpec((1, H), lambda i: (0, 0)),    # b2
            pl.BlockSpec((H, AP), lambda i: (0, 0)),   # Wm (lane-padded)
            pl.BlockSpec((1, AP), lambda i: (0, 0)),   # bm
        ],
        out_specs=pl.BlockSpec((TB, AP), lambda i: (i, 0)),
        compiler_params=pltpu.CompilerParams(
            dimension_semantics=("parallel",)),
    )(state, prepared["w1"], prepared["b1"], prepared["w2"], prepared["b2"],
      prepared["wm"], prepared["bm"])

    mean = mean_full[:B, :A]

    # std is state-independent (AddBias applied to zeros, then exp):
    # exp the [1, A] row once, broadcast over batch in plain JAX.
    std = jnp.broadcast_to(jnp.exp(prepared["log_std"]), (B, A))
    return mean, std


def init_params(key, num_inputs, num_actions, hidden_dim):
    """Deterministic init mimicking torch.nn.Linear defaults (uniform +-1/sqrt(fan_in))."""
    ks = jax.random.split(key, 6)

    def lin(kw, kb, fan_in, fan_out):
        bound = 1.0 / jnp.sqrt(fan_in)
        w = jax.random.uniform(kw, (fan_out, fan_in), jnp.float32, -bound, bound)
        b = jax.random.uniform(kb, (fan_out,), jnp.float32, -bound, bound)
        return w, b

    w1, b1 = lin(ks[0], ks[1], num_inputs, hidden_dim)
    w2, b2 = lin(ks[2], ks[3], hidden_dim, hidden_dim)
    wm, bm = lin(ks[4], ks[5], hidden_dim, num_actions)
    return {
        "w1": w1, "b1": b1,
        "w2": w2, "b2": b2,
        "mean_w": wm, "mean_b": bm,
        "log_std_bias": jnp.zeros((num_actions,), jnp.float32),  # AddBias param
    }


def _ref_forward(state, params, action_range):
    h1 = jax.nn.relu(state @ params["w1"].T + params["b1"])
    h2 = jax.nn.relu(h1 @ params["w2"].T + params["b2"])
    mean = action_range * jnp.tanh(h2 @ params["mean_w"].T + params["mean_b"])
    std = jnp.exp(jnp.broadcast_to(params["log_std_bias"][None, :], mean.shape))
    return mean, std


if __name__ == "__main__":
    NUM_INPUTS, HIDDEN, NUM_ACTIONS = 4, 32, 2
    ACTION_RANGE = 1.0

    key = jax.random.PRNGKey(0)
    k_state, k_params, k_big = jax.random.split(key, 3)
    params = init_params(k_params, NUM_INPUTS, NUM_ACTIONS, HIDDEN)

    # One-time param preparation (out of the per-step hot path).
    prepared = prepare_policy_params(params)

    forward = jax.jit(policy_network_forward,
                      static_argnames=("action_range", "block_b"))

    # --- small batch (single grid step) ---
    B = 8
    state = jax.random.normal(k_state, (B, NUM_INPUTS), dtype=jnp.float32)
    mean, std = forward(state, prepared, action_range=ACTION_RANGE)
    jax.block_until_ready((mean, std))

    mean_ref, std_ref = _ref_forward(state, params, ACTION_RANGE)
    assert mean.shape == (B, NUM_ACTIONS) and std.shape == (B, NUM_ACTIONS)
    assert jnp.allclose(mean, mean_ref, atol=1e-5), "mean mismatch (B=8)"
    assert jnp.allclose(std, std_ref, atol=1e-5), "std mismatch (B=8)"

    # --- larger, non-multiple batch (exercises batch tiling + padding) ---
    B2 = 260
    state2 = jax.random.normal(k_big, (B2, NUM_INPUTS), dtype=jnp.float32)
    mean2, std2 = forward(state2, prepared, action_range=ACTION_RANGE)
    jax.block_until_ready((mean2, std2))

    mean2_ref, std2_ref = _ref_forward(state2, params, ACTION_RANGE)
    assert mean2.shape == (B2, NUM_ACTIONS) and std2.shape == (B2, NUM_ACTIONS)
    assert jnp.allclose(mean2, mean2_ref, atol=1e-5), "mean mismatch (B=260)"
    assert jnp.allclose(std2, std2_ref, atol=1e-5), "std mismatch (B=260)"

    print("KERNEL_OK")
</pallas_src>

<mosaic_0001>
module attributes {stable_mosaic.version = 11 : i64} {
  func.func @_policy_mean_kernel(%arg0: i32, %arg1: memref<8x4xf32, #tpu.memory_space<vmem>>, %arg2: memref<4x32xf32, #tpu.memory_space<vmem>>, %arg3: memref<1x32xf32, #tpu.memory_space<vmem>>, %arg4: memref<32x32xf32, #tpu.memory_space<vmem>>, %arg5: memref<1x32xf32, #tpu.memory_space<vmem>>, %arg6: memref<32x128xf32, #tpu.memory_space<vmem>>, %arg7: memref<1x128xf32, #tpu.memory_space<vmem>>, %arg8: memref<8x128xf32, #tpu.memory_space<vmem>>) attributes {dimension_semantics = [#tpu.dimension_semantics<parallel>], iteration_bounds = array<i64: 1>, scalar_prefetch = 0 : i64, scratch_operands = 0 : i64, tpu.core_type = #tpu.core_type<tc>, window_params = [{transform_indices = @transform_0, window_bounds = array<i64: 8, 4>}, {pipeline_mode = #tpu.pipeline_mode<synchronous>, transform_indices = @transform_1, window_bounds = array<i64: 4, 32>}, {pipeline_mode = #tpu.pipeline_mode<synchronous>, transform_indices = @transform_2, window_bounds = array<i64: 1, 32>}, {pipeline_mode = #tpu.pipeline_mode<synchronous>, transform_indices = @transform_3, window_bounds = array<i64: 32, 32>}, {pipeline_mode = #tpu.pipeline_mode<synchronous>, transform_indices = @transform_4, window_bounds = array<i64: 1, 32>}, {pipeline_mode = #tpu.pipeline_mode<synchronous>, transform_indices = @transform_5, window_bounds = array<i64: 32, 128>}, {pipeline_mode = #tpu.pipeline_mode<synchronous>, transform_indices = @transform_6, window_bounds = array<i64: 1, 128>}, {transform_indices = @transform_7, window_bounds = array<i64: 8, 128>}]} {
    %c0 = arith.constant 0 : index
    %c0_0 = arith.constant 0 : index
    %0 = vector.load %arg1[%c0, %c0_0] : memref<8x4xf32, #tpu.memory_space<vmem>>, vector<8x4xf32>
    %c0_1 = arith.constant 0 : index
    %c0_2 = arith.constant 0 : index
    %1 = vector.load %arg2[%c0_1, %c0_2] : memref<4x32xf32, #tpu.memory_space<vmem>>, vector<4x32xf32>
    %cst = arith.constant dense<0.000000e+00> : vector<8x32xf32>
    %2 = tpu.matmul %0, %1, %cst {dimension_numbers = #tpu.dot_dimension_numbers<[1], [0], [0], [1], [0, 0, 1, 1], [], []>} : vector<8x4xf32>, vector<4x32xf32>, vector<8x32xf32> -> vector<8x32xf32>
    %c0_3 = arith.constant 0 : index
    %c0_4 = arith.constant 0 : index
    %3 = vector.load %arg3[%c0_3, %c0_4] : memref<1x32xf32, #tpu.memory_space<vmem>>, vector<1x32xf32>
    %4 = vector.broadcast %3 : vector<1x32xf32> to vector<8x32xf32>
    %5 = arith.addf %2, %4 : vector<8x32xf32>
    %cst_5 = arith.constant 0.000000e+00 : f32
    %6 = vector.broadcast %cst_5 : f32 to vector<8x32xf32>
    %7 = arith.maximumf %5, %6 : vector<8x32xf32>
    %c0_6 = arith.constant 0 : index
    %c0_7 = arith.constant 0 : index
    %8 = vector.load %arg4[%c0_6, %c0_7] : memref<32x32xf32, #tpu.memory_space<vmem>>, vector<32x32xf32>
    %cst_8 = arith.constant dense<0.000000e+00> : vector<8x32xf32>
    %9 = tpu.matmul %7, %8, %cst_8 {dimension_numbers = #tpu.dot_dimension_numbers<[1], [0], [0], [1], [0, 0, 1, 1], [], []>} : vector<8x32xf32>, vector<32x32xf32>, vector<8x32xf32> -> vector<8x32xf32>
    %c0_9 = arith.constant 0 : index
    %c0_10 = arith.constant 0 : index
    %10 = vector.load %arg5[%c0_9, %c0_10] : memref<1x32xf32, #tpu.memory_space<vmem>>, vector<1x32xf32>
    %11 = vector.broadcast %10 : vector<1x32xf32> to vector<8x32xf32>
    %12 = arith.addf %9, %11 : vector<8x32xf32>
    %cst_11 = arith.constant 0.000000e+00 : f32
    %13 = vector.broadcast %cst_11 : f32 to vector<8x32xf32>
    %14 = arith.maximumf %12, %13 : vector<8x32xf32>
    %c0_12 = arith.constant 0 : index
    %c0_13 = arith.constant 0 : index
    %15 = vector.load %arg6[%c0_12, %c0_13] : memref<32x128xf32, #tpu.memory_space<vmem>>, vector<32x128xf32>
    %cst_14 = arith.constant dense<0.000000e+00> : vector<8x128xf32>
    %16 = tpu.matmul %14, %15, %cst_14 {dimension_numbers = #tpu.dot_dimension_numbers<[1], [0], [0], [1], [0, 0, 1, 1], [], []>} : vector<8x32xf32>, vector<32x128xf32>, vector<8x128xf32> -> vector<8x128xf32>
    %c0_15 = arith.constant 0 : index
    %c0_16 = arith.constant 0 : index
    %17 = vector.load %arg7[%c0_15, %c0_16] : memref<1x128xf32, #tpu.memory_space<vmem>>, vector<1x128xf32>
    %18 = vector.broadcast %17 : vector<1x128xf32> to vector<8x128xf32>
    %19 = arith.addf %16, %18 : vector<8x128xf32>
    %20 = math.tanh %19 : vector<8x128xf32>
    %cst_17 = arith.constant 1.000000e+00 : f32
    %21 = vector.broadcast %cst_17 : f32 to vector<8x128xf32>
    %22 = arith.mulf %21, %20 : vector<8x128xf32>
    %c0_18 = arith.constant 0 : index
    %c0_19 = arith.constant 0 : index
    %23 = vector.load %arg8[%c0_18, %c0_19] : memref<8x128xf32, #tpu.memory_space<vmem>>, vector<8x128xf32>
    tpu.vector_store %arg8[%c0_18, %c0_19], %22 {strides = array<i32>} : memref<8x128xf32, #tpu.memory_space<vmem>>, vector<8x128xf32>,
    return
  }
  func.func @transform_0(%arg0: i32) -> (i32, i32) {
    %c0_i32 = arith.constant 0 : i32
    %c0_i32_0 = arith.constant 0 : i32
    return %arg0, %c0_i32 : i32, i32
  }
  func.func @transform_1(%arg0: i32) -> (i32, i32) {
    %c0_i32 = arith.constant 0 : i32
    %c0_i32_0 = arith.constant 0 : i32
    %c0_i32_1 = arith.constant 0 : i32
    return %c0_i32, %c0_i32_0 : i32, i32
  }
  func.func @transform_2(%arg0: i32) -> (i32, i32) {
    %c0_i32 = arith.constant 0 : i32
    %c0_i32_0 = arith.constant 0 : i32
    %c0_i32_1 = arith.constant 0 : i32
    return %c0_i32, %c0_i32_0 : i32, i32
  }
  func.func @transform_3(%arg0: i32) -> (i32, i32) {
    %c0_i32 = arith.constant 0 : i32
    %c0_i32_0 = arith.constant 0 : i32
    %c0_i32_1 = arith.constant 0 : i32
    return %c0_i32, %c0_i32_0 : i32, i32
  }
  func.func @transform_4(%arg0: i32) -> (i32, i32) {
    %c0_i32 = arith.constant 0 : i32
    %c0_i32_0 = arith.constant 0 : i32
    %c0_i32_1 = arith.constant 0 : i32
    return %c0_i32, %c0_i32_0 : i32, i32
  }
  func.func @transform_5(%arg0: i32) -> (i32, i32) {
    %c0_i32 = arith.constant 0 : i32
    %c0_i32_0 = arith.constant 0 : i32
    %c0_i32_1 = arith.constant 0 : i32
    return %c0_i32, %c0_i32_0 : i32, i32
  }
  func.func @transform_6(%arg0: i32) -> (i32, i32) {
    %c0_i32 = arith.constant 0 : i32
    %c0_i32_0 = arith.constant 0 : i32
    %c0_i32_1 = arith.constant 0 : i32
    return %c0_i32, %c0_i32_0 : i32, i32
  }
  func.func @transform_7(%arg0: i32) -> (i32, i32) {
    %c0_i32 = arith.constant 0 : i32
    %c0_i32_0 = arith.constant 0 : i32
    return %arg0, %c0_i32 : i32, i32
  }
}

</mosaic_0001>

<bundles_post_ra>
// kernel: policy_network_forward.1
= control target key start
LH: loop header
LB: loop body
LE: loop exit
PB: predicated region body
PF: predicated region fallthrough
CT: control target
= control target key end

     0   :  { %12 = vsyncpa [#allocation3], 0  ;;  %s298_s0 = inlined_call_operand.vmem [shape: f32[8,4], index: 0, kind: input, shape index: {}]   ;;  %s299_s1 = inlined_call_operand.vmem [shape: f32[4,32], index: 1, kind: input, shape index: {}]   ;;  %s300_s2 = inlined_call_operand.vmem [shape: f32[1,32], index: 2, kind: input, shape index: {}]   ;;  %s301_s3 = inlined_call_operand.hbm [shape: f32[32,32], index: 3, kind: input, shape index: {}]   ;;  %s302_s4 = inlined_call_operand.vmem [shape: f32[1,32], index: 4, kind: input, shape index: {}]   ;;  %s303_s5 = inlined_call_operand.hbm [shape: f32[32,128], index: 5, kind: input, shape index: {}]   ;;  %s304_s6 = inlined_call_operand.vmem [shape: f32[1,128], index: 6, kind: input, shape index: {}]   ;;  %s305_s7 = inlined_call_operand.vmem [shape: f32[8,128], index: 7, kind: output, shape index: {}]  }
   0x1   :  { %s24_s26 = sshll.u32 %s301_s3, 4  ;;  %s25_s26 = int_to_ptr.hbm [resolvable:$true] %s24_s26 }
   0x2   :  { %13 = vsyncpa [#allocation5], 0  ;;  %s230_s27 = smov [#allocation2]   ;;  %s39_s8 = sshll.u32 %s303_s5, 4  ;;  %s40_s8 = int_to_ptr.hbm [resolvable:$true] %s39_s8 }
   0x3   :  { %s26_s28 = sshll.u32 %s230_s27, 4  ;;  %s231_s9 = smov 128   ;;  %s27_s28 = int_to_ptr.vmem [resolvable:$true] %s26_s28 }
   0x4   :  { %s232_s10 = smov 8   ;;  %s233_s11 = smov [#allocation4]  }
   0x5   :  { %32 = dma.hbm_to_vmem [thread:$0]  %s25_s26, 512, %s27_s28, [#allocation3], %s231_s9, %s231_s9, %s232_s10  }
   0x6   :  { %s41_s12 = sshll.u32 %s233_s11, 4  ;;  %s42_s12 = int_to_ptr.vmem [resolvable:$true] %s41_s12 }
   0x7   :  { %47 = dma.hbm_to_vmem [thread:$0]  %s40_s8, 512, %s42_s12, [#allocation5], %s231_s9, %s231_s9, %s232_s10  }
   0x8   :  { %226 = dma.done.wait [#allocation3], 512  }
   0x9   :  { %227 = vsyncadd [#allocation3], 4294966784 }
   0xa   :  { %228 = dma.done.wait [#allocation5], 512  }
   0xb   :  { %229 = vsyncadd [#allocation5], 4294966784  ;;  %vm68_vm0 = vcmask 1043456   ;;  %vm64_vm1 = vcmask 31744   ;;  %v59_v0 = vld [vmem:[%s299_s1] sm:$0xf] }
   0xc   :  { %v58_v1 = vld [vmem:[%s298_s0] sm:$0xff]  ;;  %v96_v2 = vld [vmem:[#allocation2 + $0x18] sm:$0xff]  ;;  %165 = vmatpush.msk.msra.mxu0 %vm68_vm0, %v59_v0  ;;  %v95_v3 = vld [vmem:[#allocation2 + $0x10] sm:$0xff]  ;;  %vm101_vm2 = vcmask 261120  }
   0xd   :  { %117 = vmatpush.msra.mxu1 %v96_v2  ;;  %166 = vmatmul.msk.f32.vlgmr.msra.gmra.mxu0 %vm64_vm1, %v58_v1  ;;  %v94_v4 = vld [vmem:[#allocation2 + $0x8] sm:$0xff]  ;;  %v93_v5 = vld [vmem:[#allocation2] sm:$0xff]  ;;  %v129_v6 = vld [vmem:[#allocation4 + $0x18] sm:$0xff] }
   0xe   :  { %149 = vmatpush.msra.mxu2 %v129_v6  ;;  %v173_v7 = vld [vmem:[%s300_s2] ss:$0 sm:$0xff]  ;;  %v128_v11 = vld [vmem:[#allocation4 + $0x10] sm:$0xff]  ;;  %v127_v12 = vld [vmem:[#allocation4 + $0x8] sm:$0xff] }
   0xf   :  { %118 = vmatpush.msra.mxu1 %v95_v3  ;;  %v126_v13 = vld [vmem:[#allocation4] sm:$0xff] }
  0x10   :  { %150 = vmatpush.msra.mxu2 %v128_v11  ;;  %v174_v14 = vld [vmem:[%s302_s4] ss:$0 sm:$0xff] }
  0x11   :  { %119 = vmatpush.msra.mxu1 %v94_v4  ;;  %v175_v18 = vld [vmem:[%s304_s6] ss:$0 sm:$0xff] }
  0x12   :  { %151 = vmatpush.msra.mxu2 %v127_v12 }
  0x13   :  { %120 = vmatpush.msra.mxu1 %v93_v5 }
  0x14   :  { %152 = vmatpush.msra.mxu2 %v126_v13 }
  0x8a   :  { %v89_v8 = vpop.f32.mrf.mxu0 }
  0x8b   :  { %v90_v9 = vadd.f32 %v173_v7, %v89_v8 }
  0x8d   :  { %v92_v10 = vmax.f32 %v90_v9, 0.0 }
  0x8f   :  { %167 = vmatmul.msk.f32.vlgmr.msra.gmra.mxu1 %vm101_vm2, %v92_v10 }
 0x10c   :  { %v122_v15 = vpop.f32.mrf.mxu1 }
 0x10d   :  { %v123_v16 = vadd.f32 %v174_v14, %v122_v15 }
 0x10f   :  { %v125_v17 = vmax.f32 %v123_v16, 0.0 }
 0x111   :  { %168 = vmatmul.msk.f32.vlgmr.msra.gmra.mxu2 %vm101_vm2, %v125_v17 }
 0x194   :  { %v154_v19 = vpop.f32.mrf.mxu2 }
 0x195   :  { %v155_v20 = vadd.f32 %v175_v18, %v154_v19 }
 0x197   :  { %176 = vtanh.f32 %v155_v20 }
 0x19d   :  { %v177_v21 = vpop.eup %176 }
 0x19e   :  { %158 = vst [vmem:[%s305_s7] sm:$0xff] %v177_v21 }
 0x19f   :  { %163 = vsyncpa [#allocation3], 1 }
 0x1a0   :  { %164 = vsyncpa [#allocation5], 1 }

</bundles_post_ra>
